<compile_context>
chip_gen: v6e
topology: v6e:2x2x1
jax: 0.10.0
libtpu: 0.0.40
codegen_flags: <defaults>
</compile_context>

<pallas_src>
import functools

import jax
import jax.numpy as jnp
import numpy as np
from jax.experimental import pallas as pl
from jax.experimental.pallas import tpu as pltpu

_VMEM_LIMIT = 48 * 1024 * 1024  # explicit scoped-VMEM limit, safe on v5e/v6e/v7x


def _round_up(x, m):
    return ((x + m - 1) // m) * m


# ----------------------------------------------------------------------------
# Head kernel: 1x1x1 conv (per-voxel matmul over channels) + bias + Sigmoid
# Channels on sublanes, voxels on lanes (lane-dense loads AND stores).
# ----------------------------------------------------------------------------
def _head_kernel(x_ref, w_ref, b_ref, o_ref):
    # x_ref: (Cin, TVL), w_ref: (Cout, Cin), b_ref: (Cout, 1), o_ref: (Cout, TVL)
    # bf16 MXU inputs, f32 accumulation; bias + sigmoid stay in f32 (VPU/EUP).
    y = jnp.dot(
        w_ref[...].astype(jnp.bfloat16),
        x_ref[...].astype(jnp.bfloat16),
        preferred_element_type=jnp.float32,
    )
    y = y + b_ref[...]
    o_ref[...] = jax.nn.sigmoid(y).astype(o_ref.dtype)


def conv1x1x1_sigmoid(x_ncdhw, w, b, *, tvl_max=65536):
    """ConvPass(..., [[1,1,1]], activation='Sigmoid') on NCDHW input."""
    N, C, D, H, W = x_ncdhw.shape
    Cout = w.shape[0]
    V = D * H * W

    # Big voxel-lane tile (multiple of 128); ragged tail handled by Pallas'
    # partial boundary blocks (no HBM pad/slice copies).
    TVL = min(tvl_max, _round_up(V, 128))
    nv = pl.cdiv(V, TVL)

    x3 = x_ncdhw.reshape(N, C, V)            # free reshape, no transpose
    w2 = w.reshape(Cout, C)
    b2 = b.reshape(Cout, 1)

    out = pl.pallas_call(
        _head_kernel,
        out_shape=jax.ShapeDtypeStruct((N, Cout, V), x_ncdhw.dtype),
        grid_spec=pltpu.PrefetchScalarGridSpec(
            num_scalar_prefetch=0,
            grid=(N, nv),
            in_specs=[
                pl.BlockSpec((None, C, TVL), lambda n, v: (n, 0, v)),
                pl.BlockSpec((Cout, C), lambda n, v: (0, 0)),
                pl.BlockSpec((Cout, 1), lambda n, v: (0, 0)),
            ],
            out_specs=pl.BlockSpec((None, Cout, TVL), lambda n, v: (n, 0, v)),
        ),
        compiler_params=pltpu.CompilerParams(
            dimension_semantics=("parallel", "parallel"),
            vmem_limit_bytes=_VMEM_LIMIT,
        ),
    )(x3, w2, b2)

    return out.reshape(N, Cout, D, H, W)     # free reshape (already NC(out)V)


def model_forward(z0, z1, params):
    """Model.forward hot path: lsds = lsd_head(z[0]); affs = aff_head(z[1])."""
    lsds = conv1x1x1_sigmoid(z0, params["lsd_w"], params["lsd_b"])
    affs = conv1x1x1_sigmoid(z1, params["aff_w"], params["aff_b"])
    return lsds, affs


# ----------------------------------------------------------------------------
# Loss kernel: weighted MSE statistics (Loss._calc_loss)
#   - 2D free view (rows, V); wide lane blocks; ragged tail masked in-kernel.
#   - 3 scalar stats per block accumulated into a per-core (1, 128) block.
# ----------------------------------------------------------------------------
_NCORES = 2  # leading "parallel" axis: both TCs on v7x, harmless on v5e/v6e


def _loss_stats_kernel(p_ref, t_ref, w_ref, o_ref, *, v_total, tvl, nvh):
    c = pl.program_id(0)
    i = pl.program_id(1)

    @pl.when(i == 0)
    def _():
        o_ref[...] = jnp.zeros_like(o_ref)

    # Mask the ragged tail (and fully-clamped duplicate blocks) with the
    # UNCLAMPED block position, so out-of-range columns contribute nothing.
    blk = c * nvh + i
    col = blk * tvl + jax.lax.broadcasted_iota(jnp.int32, (1, tvl), 1)
    valid = col < v_total                               # (1, tvl), bcast rows

    w = jnp.where(valid, w_ref[...], 0.0)
    d = jnp.where(valid, p_ref[...] - t_ref[...], 0.0)
    scale = w * d * d                                   # == 0 where invalid

    s_scale = jnp.sum(scale)                            # sum(scale)
    s_pos = jnp.sum(jnp.where(w > 0.0, 1.0, 0.0))       # count(weights > 0)
    s_nz = jnp.sum(jnp.where(scale != 0.0, 1.0, 0.0))   # count(scale != 0)

    lane = jax.lax.broadcasted_iota(jnp.int32, o_ref.shape, 1)
    contrib = jnp.where(
        lane == 0, s_scale,
        jnp.where(lane == 1, s_pos, jnp.where(lane == 2, s_nz, 0.0)))
    o_ref[...] = o_ref[...] + contrib


def _calc_loss(pred, target, weights, *, blk_elems=1 << 19, tvl_max=65536):
    shape = pred.shape
    n_total = int(np.prod(shape))
    # Free (bitcast) 2D view: rows = leading (batch*channel) dims, V = volume.
    rows = int(np.prod(shape[:-3])) if pred.ndim > 3 else 1
    V = n_total // rows

    # ~2 MiB f32 per stream per block (6 MiB/step over 3 streams, x2 buffers).
    tvl = max(128, (blk_elems // max(rows, 1)) // 128 * 128)
    tvl = min(tvl, tvl_max, _round_up(V, 128))
    nv = pl.cdiv(V, tvl)
    nvh = pl.cdiv(nv, _NCORES)               # V-blocks per core

    def prep(a):
        return a.reshape(rows, V).astype(jnp.float32)

    p2, t2, w2 = prep(pred), prep(target), prep(weights)

    def in_map(c, i):
        # Clamp so duplicate tail blocks read valid memory; the in-kernel mask
        # zeroes their contribution.
        return (0, jnp.minimum(c * nvh + i, nv - 1))

    in_spec = pl.BlockSpec((rows, tvl), in_map)

    kernel = functools.partial(_loss_stats_kernel, v_total=V, tvl=tvl, nvh=nvh)

    out = pl.pallas_call(
        kernel,
        out_shape=jax.ShapeDtypeStruct((_NCORES, 1, 128), jnp.float32),
        grid_spec=pltpu.PrefetchScalarGridSpec(
            num_scalar_prefetch=0,
            grid=(_NCORES, nvh),
            in_specs=[in_spec, in_spec, in_spec],
            out_specs=pl.BlockSpec((None, 1, 128), lambda c, i: (c, 0, 0)),
        ),
        compiler_params=pltpu.CompilerParams(
            dimension_semantics=("parallel", "arbitrary"),
            vmem_limit_bytes=_VMEM_LIMIT,
        ),
    )(p2, t2, w2)

    stats = jnp.sum(out[:, 0, :3], axis=0)
    sum_scale, count_pos, count_nz = stats[0], stats[1], stats[2]
    # Branch replicating torch semantics (assumes weights >= 0, as in MTLSD):
    #   nonzero(scale) non-empty -> mean of scale over elements where w > 0
    #   else                     -> mean(scale)
    masked_mean = sum_scale / jnp.maximum(count_pos, 1.0)
    plain_mean = sum_scale / jnp.float32(n_total)
    return jnp.where(count_nz != 0.0, masked_mean, plain_mean)


def loss_forward(lsds_pred, lsds_tgt, lsds_w, affs_pred, affs_tgt, affs_w):
    return _calc_loss(lsds_pred, lsds_tgt, lsds_w) + _calc_loss(
        affs_pred, affs_tgt, affs_w
    )


# ----------------------------------------------------------------------------
# Pure-JAX references (for correctness check only)
# ----------------------------------------------------------------------------
def _ref_head(x, w, b):
    N, C, D, H, W = x.shape
    Cout = w.shape[0]
    x2 = jnp.transpose(x, (0, 2, 3, 4, 1)).reshape(-1, C)
    y = jax.nn.sigmoid(x2 @ w.reshape(Cout, C).T + b[None, :])
    return jnp.transpose(y.reshape(N, D, H, W, Cout), (0, 4, 1, 2, 3))


def _ref_calc_loss(pred, target, weights):
    scale = weights * (pred - target) ** 2
    has_nz = jnp.any(scale != 0)
    pos = weights > 0
    masked_mean = jnp.sum(jnp.where(pos, scale, 0.0)) / jnp.maximum(
        jnp.sum(pos.astype(jnp.float32)), 1.0
    )
    return jnp.where(has_nz, masked_mean, jnp.mean(scale))


if __name__ == "__main__":
    key = jax.random.PRNGKey(0)
    k = jax.random.split(key, 12)

    # Small synthetic shapes consistent with the MTLSD 3D UNet heads:
    # UNet out_channels = 16, lsd_head -> 10 channels, aff_head -> 3 channels.
    N, Cin, D, H, W = 2, 16, 8, 8, 8
    C_LSD, C_AFF = 10, 3

    # UNet feature outputs z[0], z[1] (backbone itself not reproduced).
    z0 = jax.random.normal(k[0], (N, Cin, D, H, W), jnp.float32)
    z1 = jax.random.normal(k[1], (N, Cin, D, H, W), jnp.float32)

    params = {
        "lsd_w": 0.1 * jax.random.normal(k[2], (C_LSD, Cin), jnp.float32),
        "lsd_b": 0.01 * jax.random.normal(k[3], (C_LSD,), jnp.float32),
        "aff_w": 0.1 * jax.random.normal(k[4], (C_AFF, Cin), jnp.float32),
        "aff_b": 0.01 * jax.random.normal(k[5], (C_AFF,), jnp.float32),
    }

    lsds, affs = jax.jit(model_forward)(z0, z1, params)
    jax.block_until_ready((lsds, affs))

    # Loss inputs.
    lsds_tgt = jax.random.uniform(k[6], lsds.shape, jnp.float32)
    affs_tgt = jax.random.uniform(k[7], affs.shape, jnp.float32)
    u0 = jax.random.uniform(k[8], lsds.shape, jnp.float32)
    u1 = jax.random.uniform(k[9], affs.shape, jnp.float32)
    lsds_w = jnp.where(u0 > 0.3, u0, 0.0)  # some zero weights -> exercise mask
    affs_w = jnp.where(u1 > 0.3, u1, 0.0)

    total_loss = jax.jit(loss_forward)(
        lsds, lsds_tgt, lsds_w, affs, affs_tgt, affs_w
    )
    jax.block_until_ready(total_loss)

    # Correctness checks. Heads use bf16 MXU inputs with f32 accumulation, so
    # allow a small absolute tolerance vs. the pure-f32 reference.
    lsds_ref = _ref_head(z0, params["lsd_w"], params["lsd_b"])
    affs_ref = _ref_head(z1, params["aff_w"], params["aff_b"])
    loss_ref = _ref_calc_loss(lsds, lsds_tgt, lsds_w) + _ref_calc_loss(
        affs, affs_tgt, affs_w
    )
    np.testing.assert_allclose(np.asarray(lsds), np.asarray(lsds_ref), atol=3e-3)
    np.testing.assert_allclose(np.asarray(affs), np.asarray(affs_ref), atol=3e-3)
    np.testing.assert_allclose(
        np.asarray(total_loss), np.asarray(loss_ref), rtol=2e-5, atol=1e-6
    )

    print("KERNEL_OK")
</pallas_src>

<mosaic_0001>
module attributes {stable_mosaic.version = 11 : i64} {
  func.func @_head_kernel(%arg0: i32, %arg1: i32, %arg2: memref<1x16x512xf32, #tpu.memory_space<vmem>>, %arg3: memref<10x16xf32, #tpu.memory_space<vmem>>, %arg4: memref<10x1xf32, #tpu.memory_space<vmem>>, %arg5: memref<1x10x512xf32, #tpu.memory_space<vmem>>) attributes {dimension_semantics = [#tpu.dimension_semantics<parallel>, #tpu.dimension_semantics<parallel>], iteration_bounds = array<i64: 2, 1>, scalar_prefetch = 0 : i64, scratch_operands = 0 : i64, tpu.core_type = #tpu.core_type<tc>, window_params = [{transform_indices = @transform_0, window_bounds = array<i64: 1, 16, 512>}, {pipeline_mode = #tpu.pipeline_mode<synchronous>, transform_indices = @transform_1, window_bounds = array<i64: 10, 16>}, {pipeline_mode = #tpu.pipeline_mode<synchronous>, transform_indices = @transform_2, window_bounds = array<i64: 10, 1>}, {transform_indices = @transform_3, window_bounds = array<i64: 1, 10, 512>}]} {
    %c0 = arith.constant 0 : index
    %c0_0 = arith.constant 0 : index
    %0 = vector.load %arg3[%c0, %c0_0] : memref<10x16xf32, #tpu.memory_space<vmem>>, vector<10x16xf32>
    %1 = arith.truncf %0 : vector<10x16xf32> to vector<10x16xbf16>
    %c0_1 = arith.constant 0 : index
    %c0_2 = arith.constant 0 : index
    %c0_3 = arith.constant 0 : index
    %2 = vector.load %arg2[%c0_1, %c0_2, %c0_3] : memref<1x16x512xf32, #tpu.memory_space<vmem>>, vector<1x16x512xf32>
    %3 = vector.shape_cast %2 : vector<1x16x512xf32> to vector<16x512xf32>
    %4 = arith.truncf %3 : vector<16x512xf32> to vector<16x512xbf16>
    %cst = arith.constant dense<0.000000e+00> : vector<10x512xf32>
    %5 = tpu.matmul %1, %4, %cst {dimension_numbers = #tpu.dot_dimension_numbers<[1], [0], [0], [1], [0, 0, 1, 1], [], []>} : vector<10x16xbf16>, vector<16x512xbf16>, vector<10x512xf32> -> vector<10x512xf32>
    %c0_4 = arith.constant 0 : index
    %c0_5 = arith.constant 0 : index
    %6 = vector.load %arg4[%c0_4, %c0_5] : memref<10x1xf32, #tpu.memory_space<vmem>>, vector<10x1xf32>
    %7 = vector.broadcast %6 : vector<10x1xf32> to vector<10x512xf32>
    %8 = arith.addf %5, %7 : vector<10x512xf32>
    %9 = arith.negf %8 : vector<10x512xf32>
    %10 = math.exp %9 : vector<10x512xf32>
    %cst_6 = arith.constant 1.000000e+00 : f32
    %11 = vector.broadcast %cst_6 : f32 to vector<10x512xf32>
    %12 = arith.addf %11, %10 : vector<10x512xf32>
    %13 = arith.divf %11, %12 : vector<10x512xf32>
    %c0_7 = arith.constant 0 : index
    %c0_8 = arith.constant 0 : index
    %c0_9 = arith.constant 0 : index
    %14 = vector.load %arg5[%c0_7, %c0_8, %c0_9] : memref<1x10x512xf32, #tpu.memory_space<vmem>>, vector<1x10x512xf32>
    %15 = vector.shape_cast %14 : vector<1x10x512xf32> to vector<10x512xf32>
    %16 = vector.shape_cast %13 : vector<10x512xf32> to vector<1x10x512xf32>
    tpu.vector_store %arg5[%c0_7, %c0_8, %c0_9], %16 {strides = array<i32>} : memref<1x10x512xf32, #tpu.memory_space<vmem>>, vector<1x10x512xf32>,
    return
  }
  func.func @transform_0(%arg0: i32, %arg1: i32) -> (i32, i32, i32) {
    %c0_i32 = arith.constant 0 : i32
    %c0_i32_0 = arith.constant 0 : i32
    return %arg0, %c0_i32, %arg1 : i32, i32, i32
  }
  func.func @transform_1(%arg0: i32, %arg1: i32) -> (i32, i32) {
    %c0_i32 = arith.constant 0 : i32
    %c0_i32_0 = arith.constant 0 : i32
    %c0_i32_1 = arith.constant 0 : i32
    return %c0_i32, %c0_i32_0 : i32, i32
  }
  func.func @transform_2(%arg0: i32, %arg1: i32) -> (i32, i32) {
    %c0_i32 = arith.constant 0 : i32
    %c0_i32_0 = arith.constant 0 : i32
    %c0_i32_1 = arith.constant 0 : i32
    return %c0_i32, %c0_i32_0 : i32, i32
  }
  func.func @transform_3(%arg0: i32, %arg1: i32) -> (i32, i32, i32) {
    %c0_i32 = arith.constant 0 : i32
    %c0_i32_0 = arith.constant 0 : i32
    return %arg0, %c0_i32, %arg1 : i32, i32, i32
  }
}

module attributes {stable_mosaic.version = 11 : i64} {
  func.func @_head_kernel(%arg0: i32, %arg1: i32, %arg2: memref<1x16x512xf32, #tpu.memory_space<vmem>>, %arg3: memref<3x16xf32, #tpu.memory_space<vmem>>, %arg4: memref<3x1xf32, #tpu.memory_space<vmem>>, %arg5: memref<1x3x512xf32, #tpu.memory_space<vmem>>) attributes {dimension_semantics = [#tpu.dimension_semantics<parallel>, #tpu.dimension_semantics<parallel>], iteration_bounds = array<i64: 2, 1>, scalar_prefetch = 0 : i64, scratch_operands = 0 : i64, tpu.core_type = #tpu.core_type<tc>, window_params = [{transform_indices = @transform_0, window_bounds = array<i64: 1, 16, 512>}, {pipeline_mode = #tpu.pipeline_mode<synchronous>, transform_indices = @transform_1, window_bounds = array<i64: 3, 16>}, {pipeline_mode = #tpu.pipeline_mode<synchronous>, transform_indices = @transform_2, window_bounds = array<i64: 3, 1>}, {transform_indices = @transform_3, window_bounds = array<i64: 1, 3, 512>}]} {
    %c0 = arith.constant 0 : index
    %c0_0 = arith.constant 0 : index
    %0 = vector.load %arg3[%c0, %c0_0] : memref<3x16xf32, #tpu.memory_space<vmem>>, vector<3x16xf32>
    %1 = arith.truncf %0 : vector<3x16xf32> to vector<3x16xbf16>
    %c0_1 = arith.constant 0 : index
    %c0_2 = arith.constant 0 : index
    %c0_3 = arith.constant 0 : index
    %2 = vector.load %arg2[%c0_1, %c0_2, %c0_3] : memref<1x16x512xf32, #tpu.memory_space<vmem>>, vector<1x16x512xf32>
    %3 = vector.shape_cast %2 : vector<1x16x512xf32> to vector<16x512xf32>
    %4 = arith.truncf %3 : vector<16x512xf32> to vector<16x512xbf16>
    %cst = arith.constant dense<0.000000e+00> : vector<3x512xf32>
    %5 = tpu.matmul %1, %4, %cst {dimension_numbers = #tpu.dot_dimension_numbers<[1], [0], [0], [1], [0, 0, 1, 1], [], []>} : vector<3x16xbf16>, vector<16x512xbf16>, vector<3x512xf32> -> vector<3x512xf32>
    %c0_4 = arith.constant 0 : index
    %c0_5 = arith.constant 0 : index
    %6 = vector.load %arg4[%c0_4, %c0_5] : memref<3x1xf32, #tpu.memory_space<vmem>>, vector<3x1xf32>
    %7 = vector.broadcast %6 : vector<3x1xf32> to vector<3x512xf32>
    %8 = arith.addf %5, %7 : vector<3x512xf32>
    %9 = arith.negf %8 : vector<3x512xf32>
    %10 = math.exp %9 : vector<3x512xf32>
    %cst_6 = arith.constant 1.000000e+00 : f32
    %11 = vector.broadcast %cst_6 : f32 to vector<3x512xf32>
    %12 = arith.addf %11, %10 : vector<3x512xf32>
    %13 = arith.divf %11, %12 : vector<3x512xf32>
    %c0_7 = arith.constant 0 : index
    %c0_8 = arith.constant 0 : index
    %c0_9 = arith.constant 0 : index
    %14 = vector.load %arg5[%c0_7, %c0_8, %c0_9] : memref<1x3x512xf32, #tpu.memory_space<vmem>>, vector<1x3x512xf32>
    %15 = vector.shape_cast %14 : vector<1x3x512xf32> to vector<3x512xf32>
    %16 = vector.shape_cast %13 : vector<3x512xf32> to vector<1x3x512xf32>
    tpu.vector_store %arg5[%c0_7, %c0_8, %c0_9], %16 {strides = array<i32>} : memref<1x3x512xf32, #tpu.memory_space<vmem>>, vector<1x3x512xf32>,
    return
  }
  func.func @transform_0(%arg0: i32, %arg1: i32) -> (i32, i32, i32) {
    %c0_i32 = arith.constant 0 : i32
    %c0_i32_0 = arith.constant 0 : i32
    return %arg0, %c0_i32, %arg1 : i32, i32, i32
  }
  func.func @transform_1(%arg0: i32, %arg1: i32) -> (i32, i32) {
    %c0_i32 = arith.constant 0 : i32
    %c0_i32_0 = arith.constant 0 : i32
    %c0_i32_1 = arith.constant 0 : i32
    return %c0_i32, %c0_i32_0 : i32, i32
  }
  func.func @transform_2(%arg0: i32, %arg1: i32) -> (i32, i32) {
    %c0_i32 = arith.constant 0 : i32
    %c0_i32_0 = arith.constant 0 : i32
    %c0_i32_1 = arith.constant 0 : i32
    return %c0_i32, %c0_i32_0 : i32, i32
  }
  func.func @transform_3(%arg0: i32, %arg1: i32) -> (i32, i32, i32) {
    %c0_i32 = arith.constant 0 : i32
    %c0_i32_0 = arith.constant 0 : i32
    return %arg0, %c0_i32, %arg1 : i32, i32, i32
  }
}

</mosaic_0001>

<bundles_post_ra>
// kernel: model_forward.2
= control target key start
LH: loop header
LB: loop body
LE: loop exit
PB: predicated region body
PF: predicated region fallthrough
CT: control target
= control target key end

     0   :  { %s597_s12 = smov 0   ;;  %s599_s13 = smov 0   ;;  %s649_s0 = inlined_call_operand.vmem [shape: f32[2,16,512], index: 0, kind: input, shape index: {}]   ;;  %s650_s1 = inlined_call_operand.vmem [shape: f32[10,16], index: 1, kind: input, shape index: {}]   ;;  %s651_s2 = inlined_call_operand.vmem [shape: f32[10,1], index: 2, kind: input, shape index: {}]   ;;  %s652_s3 = inlined_call_operand.vmem [shape: f32[2,10,512], index: 3, kind: output, shape index: {}]  }
   0x1   :  { %s601_s14 = smov 0  }
   0x2 LB: > { %s25_s15 = sadd.s32 1, %s570_s13  ;;  %p475_p0 = scmp.ge.s32.totalorder %s574_s14, 1  ;;  %s574_s14 = sphi %s601_s14, %s13_s14   ;;  %s570_s13 = sphi %s599_s13, %s654_s13   ;;  %s566_s12 = sphi %s597_s12, %s653_s12  }
   0x3   : > { %p27_p1 = scmp.ge.s32.totalorder %s25_s15, 2  ;;  %p158_p2 = scmp.lt.s32.totalorder %s574_s14, 3 }
   0x5   : > { %s656_s15 = smov (%p27_p1, %s25_s15), 0  ;;  %p159_p3 = pnand %p475_p0, %p158_p2 }
   0x6   : > { %p191_p4 = scmp.lt.s32.totalorder (!%p159_p3), %s566_s12, 1 }
   0x7   : > { %162 = sbr.rel (%p159_p3) target bundleno = 258 (0x102), region = 32 }
   0xc   : > { %v576_v0 = vmov 0   ;;  %v226_v1 = vld [vmem:[%s651_s2] sm:$0xff]  ;;  %s658_s12 = smov (!%p191_p4, %s566_s12), 1  ;;  %v227_v2 = vld [vmem:[%s651_s2 + $0x8] sm:$0x3]  ;;  %vm238_vm0 = vcmask 130048  }
   0xd   : > { %274 = vmatprep.mubr.bf16.mxu0 %v576_v0  ;;  %317 = vmatprep.mubr.bf16.mxu1 %v576_v0  ;;  %s492_s18 = sshll.u32 %s658_s12, 6  ;;  %v211_v3 = vld [vmem:[%s650_s1] sm:$0xff]  ;;  %v212_v4 = vld [vmem:[%s650_s1 + $0x8] sm:$0x3] }
   0xe   : > { %519 = vset.pattern.permute.xlu0 %v576_v0  ;;  %s198_s23 = scalar_lea.vmem %s649_s0, %s492_s18  ;;  %v213_v17 = vpack.c.bf16 %v212_v4, %v211_v3  ;;  %s208_s30 = scalar_lea.vmem %s652_s3, %s492_s18 }
   0xf   : > { %230 = vperm.xlu0 %519, %v226_v1   ;;  %v215_v5 = vld [vmem:[%s198_s23 + $0x8] sm:$0xff]  ;;  %v217_v7 = vld [vmem:[%s198_s23 + $0x18] sm:$0xff]  ;;  %v214_v10 = vld [vmem:[%s198_s23] sm:$0xff] }
  0x10   : > { %v219_v6 = vld [vmem:[%s198_s23 + $0x28] sm:$0xff]  ;;  %v221_v9 = vld [vmem:[%s198_s23 + $0x38] sm:$0xff]  ;;  %v218_v11 = vld [vmem:[%s198_s23 + $0x20] sm:$0xff] }
  0x11   : > { %v223_v8 = vpack.c.bf16 %v219_v6, %v215_v5  ;;  %v225_v12 = vpack.c.bf16 %v221_v9, %v217_v7  ;;  %v222_v13 = vpack.c.bf16 %v218_v11, %v214_v10  ;;  %v216_v14 = vld [vmem:[%s198_s23 + $0x10] sm:$0xff] }
  0x12   : > { %v220_v15 = vld [vmem:[%s198_s23 + $0x30] sm:$0xff] }
  0x13   : > { %235 = vperm.xlu0 %519, %v227_v2   ;;  %256 = vmatprep.subr.bf16.mxu0 %v223_v8  ;;  %v224_v16 = vpack.c.bf16 %v220_v15, %v216_v14 }
  0x14   : > { %299 = vmatprep.subr.bf16.mxu1 %v225_v12  ;;  %257 = vmatpush1.bf16.msra.mxu0 %v222_v13 }
  0x15   : > { %300 = vmatpush1.bf16.msra.mxu1 %v224_v16 }
  0x17   : > { %480 = vmatmul.mubr.msk.bf16.vlgmr.msra.gmra.mxu0 %vm238_vm0, %v213_v17 }
  0x18   : > { %481 = vmatmul.mubr.msk.bf16.vlgmr.msra.gmra.mxu1 %vm238_vm0, %v213_v17 }
  0x8a   : > { %v231_v18 = vpop.permute.xlu0 %230 }
  0x8e   : > { %v236_v28 = vpop.permute.xlu0 %235 }
  0xd7   : > { %v276_v19 = vpop.f32.mrf.mxu0 }
  0xd8   : > { %v277_v20 = vadd.f32 %v276_v19, %v231_v18  ;;  %v319_v21 = vpop.f32.mrf.mxu1 }
  0xd9   : > { %v320_v22 = vadd.f32 %v319_v21, %v231_v18  ;;  %v278_v23 = vpop.f32.mrf.mxu0 }
  0xda   : > { %v482_v24 = vmul.f32 -1.442695, %v277_v20  ;;  %v279_v25 = vadd.f32 %v278_v23, %v231_v18  ;;  %v321_v26 = vpop.f32.mrf.mxu1 }
  0xdb   : > { %v484_v27 = vmul.f32 -1.442695, %v320_v22  ;;  %v322_v29 = vadd.f32 %v321_v26, %v231_v18  ;;  %v280_v30 = vpop.f32.mrf.mxu0 }
  0xdc   : > { %520 = vpow2.f32 %v482_v24  ;;  %v483_v31 = vmul.f32 -1.442695, %v279_v25  ;;  %v281_v32 = vadd.f32 %v280_v30, %v236_v28  ;;  %v323_v33 = vpop.f32.mrf.mxu1 }
  0xdd   : > { %522 = vpow2.f32 %v484_v27  ;;  %v485_v34 = vmul.f32 -1.442695, %v322_v29  ;;  %v324_v35 = vadd.f32 %v323_v33, %v236_v28  ;;  %v282_v36 = vpop.f32.mrf.mxu0 }
  0xde   : > { %524 = vpow2.f32 %v483_v31  ;;  %v486_v37 = vmul.f32 -1.442695, %v281_v32  ;;  %v283_v38 = vadd.f32 %v282_v36, %v236_v28  ;;  %v325_v39 = vpop.f32.mrf.mxu1 }
  0xdf   : > { %526 = vpow2.f32 %v485_v34  ;;  %v488_v40 = vmul.f32 -1.442695, %v324_v35  ;;  %v326_v41 = vadd.f32 %v325_v39, %v236_v28 }
  0xe0   : > { %528 = vpow2.f32 %v486_v37  ;;  %v487_v42 = vmul.f32 -1.442695, %v283_v38 }
  0xe1   : > { %530 = vpow2.f32 %v488_v40  ;;  %v489_v43 = vmul.f32 -1.442695, %v326_v41 }
  0xe2   : > { %532 = vpow2.f32 %v487_v42 }
  0xe3   : > { %534 = vpow2.f32 %v489_v43 }
  0xe9   : > { %v521_v44 = vpop.eup %520 }
  0xea   : > { %v523_v45 = vpop.eup %522  ;;  %v352_v46 = vadd.f32 1.0, %v521_v44 }
  0xeb   : > { %v525_v47 = vpop.eup %524  ;;  %v354_v48 = vadd.f32 1.0, %v523_v45 }
  0xec   : > { %v527_v49 = vpop.eup %526  ;;  %536 = vrcp.f32 %v352_v46  ;;  %v353_v50 = vadd.f32 1.0, %v525_v47 }
  0xed   : > { %v529_v51 = vpop.eup %528  ;;  %538 = vrcp.f32 %v354_v48  ;;  %v355_v52 = vadd.f32 1.0, %v527_v49 }
  0xee   : > { %v531_v53 = vpop.eup %530  ;;  %540 = vrcp.f32 %v353_v50  ;;  %v356_v54 = vadd.f32 1.0, %v529_v51 }
  0xef   : > { %v533_v55 = vpop.eup %532  ;;  %542 = vrcp.f32 %v355_v52  ;;  %v358_v56 = vadd.f32 1.0, %v531_v53 }
  0xf0   : > { %v535_v57 = vpop.eup %534  ;;  %544 = vrcp.f32 %v356_v54  ;;  %v357_v58 = vadd.f32 1.0, %v533_v55 }
  0xf1   : > { %546 = vrcp.f32 %v358_v56  ;;  %v359_v59 = vadd.f32 1.0, %v535_v57 }
  0xf2   : > { %548 = vrcp.f32 %v357_v58 }
  0xf3   : > { %550 = vrcp.f32 %v359_v59 }
  0xf9   : > { %v537_v60 = vpop.eup %536 }
  0xfa   : > { %v539_v61 = vpop.eup %538  ;;  %376 = vst [vmem:[%s208_s30] sm:$0xff] %v537_v60 }
  0xfb   : > { %v541_v62 = vpop.eup %540  ;;  %378 = vst [vmem:[%s208_s30 + $0x10] sm:$0xff] %v539_v61 }
  0xfc   : > { %v543_v63 = vpop.eup %542  ;;  %377 = vst [vmem:[%s208_s30 + $0x8] sm:$0xff] %v541_v62 }
  0xfd   : > { %v545_v0 = vpop.eup %544  ;;  %379 = vst [vmem:[%s208_s30 + $0x18] sm:$0xff] %v543_v63 }
  0xfe   : > { %v547_v1 = vpop.eup %546  ;;  %380 = vst [vmem:[%s208_s30 + $0x20] sm:$0x3] %v545_v0 }
  0xff   : > { %v549_v2 = vpop.eup %548  ;;  %382 = vst [vmem:[%s208_s30 + $0x30] sm:$0x3] %v547_v1 }
 0x100   : > { %v551_v3 = vpop.eup %550  ;;  %381 = vst [vmem:[%s208_s30 + $0x28] sm:$0x3] %v549_v2 }
 0x101   : > { %383 = vst [vmem:[%s208_s30 + $0x38] sm:$0x3] %v551_v3 }
 0x102 PF: > { %s13_s14 = sadd.s32 1, %s574_s14   ;;  %s653_s12 = smov %s570_s13 }
 0x103   : > { %p10_p5 = scmp.ge.s32.totalorder %s13_s14, 4   ;;  %s654_s13 = smov %s656_s15 }
 0x105   :  { %12 = sbr.rel (!%p10_p5) target bundleno = 2 (0x2), region = 62 }

// kernel: model_forward.3
= control target key start
LH: loop header
LB: loop body
LE: loop exit
PB: predicated region body
PF: predicated region fallthrough
CT: control target
= control target key end

     0   :  { %s544_s12 = smov 0   ;;  %s546_s13 = smov 0   ;;  %s587_s0 = inlined_call_operand.vmem [shape: f32[2,16,512], index: 0, kind: input, shape index: {}]   ;;  %s588_s1 = inlined_call_operand.vmem [shape: f32[3,16], index: 1, kind: input, shape index: {}]   ;;  %s589_s2 = inlined_call_operand.vmem [shape: f32[3,1], index: 2, kind: input, shape index: {}]   ;;  %s590_s3 = inlined_call_operand.vmem [shape: f32[2,3,512], index: 3, kind: output, shape index: {}]  }
   0x1   :  { %s548_s14 = smov 0  }
   0x2 LB: > { %s25_s15 = sadd.s32 1, %s517_s13  ;;  %p442_p0 = scmp.ge.s32.totalorder %s521_s14, 1  ;;  %s521_s14 = sphi %s548_s14, %s13_s14   ;;  %s517_s13 = sphi %s546_s13, %s592_s13   ;;  %s513_s12 = sphi %s544_s12, %s591_s12  }
   0x3   : > { %p27_p1 = scmp.ge.s32.totalorder %s25_s15, 2  ;;  %p158_p2 = scmp.lt.s32.totalorder %s521_s14, 3 }
   0x5   : > { %s594_s15 = smov (%p27_p1, %s25_s15), 0  ;;  %p159_p3 = pnand %p442_p0, %p158_p2 }
   0x6   : > { %p191_p4 = scmp.lt.s32.totalorder (!%p159_p3), %s513_s12, 1 }
   0x7   : > { %162 = sbr.rel (%p159_p3) target bundleno = 256 (0x100), region = 32 }
   0xc   : > { %v523_v0 = vmov 0   ;;  %v225_v1 = vld [vmem:[%s589_s2] sm:$0x7]  ;;  %s596_s12 = smov (!%p191_p4, %s513_s12), 1  ;;  %vm231_vm0 = vcmask 130048  }
   0xd   : > { %267 = vmatprep.mubr.bf16.mxu0 %v523_v0  ;;  %308 = vmatprep.mubr.bf16.mxu1 %v523_v0  ;;  %s455_s18 = sshll.u32 %s596_s12, 6  ;;  %v211_v2 = vld [vmem:[%s588_s1] sm:$0x7]  ;;  %s456_s24 = sshll.u32 %s596_s12, 4 }
   0xe   : > { %482 = vset.pattern.permute.xlu0 %v523_v0  ;;  %s198_s21 = scalar_lea.vmem %s587_s0, %s455_s18  ;;  %v212_v15 = vpack.c.bf16 %v211_v2, %v211_v2  ;;  %s208_s27 = scalar_lea.vmem %s590_s3, %s456_s24 }
   0xf   : > { %228 = vperm.xlu0 %482, %v225_v1   ;;  %v214_v3 = vld [vmem:[%s198_s21 + $0x8] sm:$0xff]  ;;  %v216_v5 = vld [vmem:[%s198_s21 + $0x18] sm:$0xff]  ;;  %v213_v8 = vld [vmem:[%s198_s21] sm:$0xff] }
  0x10   : > { %v218_v4 = vld [vmem:[%s198_s21 + $0x28] sm:$0xff]  ;;  %v220_v7 = vld [vmem:[%s198_s21 + $0x38] sm:$0xff]  ;;  %v217_v9 = vld [vmem:[%s198_s21 + $0x20] sm:$0xff] }
  0x11   : > { %v222_v6 = vpack.c.bf16 %v218_v4, %v214_v3  ;;  %v224_v10 = vpack.c.bf16 %v220_v7, %v216_v5  ;;  %v221_v11 = vpack.c.bf16 %v217_v9, %v213_v8  ;;  %v215_v12 = vld [vmem:[%s198_s21 + $0x10] sm:$0xff] }
  0x12   : > { %v219_v13 = vld [vmem:[%s198_s21 + $0x30] sm:$0xff] }
  0x13   : > { %249 = vmatprep.subr.bf16.mxu0 %v222_v6  ;;  %v223_v14 = vpack.c.bf16 %v219_v13, %v215_v12  ;;  %290 = vmatprep.subr.bf16.mxu1 %v224_v10 }
  0x14   : > { %250 = vmatpush1.bf16.msra.mxu0 %v221_v11 }
  0x15   : > { %291 = vmatpush1.bf16.msra.mxu1 %v223_v14 }
  0x17   : > { %447 = vmatmul.mubr.msk.bf16.vlgmr.msra.gmra.mxu0 %vm231_vm0, %v212_v15 }
  0x18   : > { %448 = vmatmul.mubr.msk.bf16.vlgmr.msra.gmra.mxu1 %vm231_vm0, %v212_v15 }
  0x8a   : > { %v229_v16 = vpop.permute.xlu0 %228 }
  0xd7   : > { %v269_v17 = vpop.f32.mrf.mxu0 }
  0xd8   : > { %v270_v18 = vadd.f32 %v269_v17, %v229_v16  ;;  %v310_v19 = vpop.f32.mrf.mxu1 }
  0xd9   : > { %v311_v20 = vadd.f32 %v310_v19, %v229_v16  ;;  %v271_v21 = vpop.f32.mrf.mxu0 }
  0xda   : > { %v449_v22 = vmul.f32 -1.442695, %v270_v18  ;;  %v272_v23 = vadd.f32 %v271_v21, %v229_v16  ;;  %v312_v24 = vpop.f32.mrf.mxu1 }
  0xdb   : > { %v451_v25 = vmul.f32 -1.442695, %v311_v20  ;;  %v313_v26 = vadd.f32 %v312_v24, %v229_v16  ;;  %v273_v27 = vpop.f32.mrf.mxu0 }
  0xdc   : > { %483 = vpow2.f32 %v449_v22  ;;  %v450_v28 = vmul.f32 -1.442695, %v272_v23  ;;  %v314_v29 = vpop.f32.mrf.mxu1 }
  0xdd   : > { %485 = vpow2.f32 %v451_v25  ;;  %v452_v30 = vmul.f32 -1.442695, %v313_v26  ;;  %v274_v31 = vpop.f32.mrf.mxu0 }
  0xde   : > { %487 = vpow2.f32 %v450_v28  ;;  %v315_v32 = vpop.f32.mrf.mxu1 }
  0xdf   : > { %489 = vpow2.f32 %v452_v30 }
  0xe9   : > { %v484_v33 = vpop.eup %483 }
  0xea   : > { %v486_v34 = vpop.eup %485  ;;  %v329_v35 = vadd.f32 1.0, %v484_v33 }
  0xeb   : > { %v488_v36 = vpop.eup %487  ;;  %v331_v37 = vadd.f32 1.0, %v486_v34 }
  0xec   : > { %v490_v38 = vpop.eup %489  ;;  %491 = vrcp.f32 %v329_v35  ;;  %v330_v39 = vadd.f32 1.0, %v488_v36 }
  0xed   : > { %493 = vrcp.f32 %v331_v37  ;;  %v332_v40 = vadd.f32 1.0, %v490_v38 }
  0xee   : > { %495 = vrcp.f32 %v330_v39 }
  0xef   : > { %497 = vrcp.f32 %v332_v40 }
  0xf9   : > { %v492_v41 = vpop.eup %491 }
  0xfa   : > { %v494_v42 = vpop.eup %493 }
  0xfb   : > { %v496_v43 = vpop.eup %495 }
  0xfc   : > { %v498_v44 = vpop.eup %497  ;;  %v345_v45 = vcombine.low %v492_v41, %v496_v43 }
  0xfd   : > { %v346_v46 = vcombine.low %v494_v42, %v498_v44 }
  0xfe   : > { %349 = vst [vmem:[%s208_s27] sm:$0x77] %v345_v45 }
  0xff   : > { %350 = vst [vmem:[%s208_s27 + $0x8] sm:$0x77] %v346_v46 }
 0x100 PF: > { %s13_s14 = sadd.s32 1, %s521_s14   ;;  %s591_s12 = smov %s517_s13 }
 0x101   : > { %p10_p5 = scmp.ge.s32.totalorder %s13_s14, 4   ;;  %s592_s13 = smov %s594_s15 }
 0x103   :  { %12 = sbr.rel (!%p10_p5) target bundleno = 2 (0x2), region = 62 }

</bundles_post_ra>
